<compile_context>
chip_gen: v7x
topology: tpu7x:2x2x1
jax: 0.10.0
libtpu: 0.0.40
codegen_flags: <defaults>
</compile_context>

<pallas_src>
import jax
import jax.numpy as jnp
from jax.experimental import pallas as pl
from jax.experimental.pallas import tpu as pltpu


# ----------------------------- Pallas kernels ------------------------------ #

def _align_conv_kernel(x_ref, w_ref, b_ref, o_ref):
    # x_ref: [Bb*c_in, TN]   (2-D batch-folded view, sublane-full)
    # w_ref: [Bb*c_out, Bb*c_in]  block-diagonal weight = kron(I_Bb, W)
    # b_ref: [Bb*c_out, 1]
    # o_ref: [Bb*c_out, TN]  (sublane-full, lane-dense store)
    y = jnp.dot(w_ref[...], x_ref[...], preferred_element_type=jnp.float32)
    o_ref[...] = (y + b_ref[...]).astype(o_ref.dtype)


def _align_pad_kernel(x_ref, o_ref):
    # x_ref: [Bb, c_in, TN], o_ref: [Bb, c_out, TN]; zero-pad channel axis.
    bb, c_in, tn = x_ref.shape
    c_out = o_ref.shape[1]
    o_ref[:, :c_in, :] = x_ref[...]
    o_ref[:, c_in:, :] = jnp.zeros((bb, c_out - c_in, tn), o_ref.dtype)


# ------------------------------ helpers ------------------------------------ #

def _pick_batch_block(B, c_in, c_out, tn,
                      mxu_cap=128, byte_budget=8 * 1024 * 1024):
    """Largest divisor Bb of B s.t. Bb*max(c)<=128 and blocks fit VMEM budget."""
    per_b_bytes = 2 * (c_in + c_out) * tn * 4      # double-buffered in + out
    bb_cap = max(1, min(mxu_cap // max(c_in, c_out),
                        byte_budget // max(per_b_bytes, 1)))
    bb = 1
    for d in range(1, B + 1):
        if B % d == 0 and d <= bb_cap:
            bb = d
    return bb


def make_align_params(key, c_in, c_out):
    """Conv2d(c_in, c_out, (1,1)) weights, pre-shaped [c_out, c_in]/[c_out, 1]."""
    if c_in <= c_out:
        return {}
    kw, kb = jax.random.split(key)
    return {
        "w": 0.1 * jax.random.normal(kw, (c_out, c_in), dtype=jnp.float32),
        "b": 0.1 * jax.random.normal(kb, (c_out, 1), dtype=jnp.float32),
    }


# ------------------------------ wrapper ------------------------------------ #

def align_forward(x, params, c_in, c_out, use_bf16_inputs=False):
    """Align.forward.  x: NCHW [B, c_in, T, N] -> [B, c_out, T, N]."""
    B, Cin, T, N = x.shape
    assert Cin == c_in
    if c_in == c_out:
        return x                                    # identity branch

    TN = T * N
    Bb = _pick_batch_block(B, c_in, c_out, TN)
    num_blocks = B // Bb
    cparams = pltpu.CompilerParams(dimension_semantics=("parallel",))

    if c_in > c_out:                                # 1x1 conv branch (MXU)
        if "w" not in params or "b" not in params:
            raise ValueError("align_forward: c_in > c_out requires conv params")
        # Block-diagonal weight/tiled bias so Bb batches fold into one matmul.
        w_bd = jnp.kron(jnp.eye(Bb, dtype=params["w"].dtype), params["w"])
        b_bd = jnp.tile(params["b"], (Bb, 1))       # [Bb*c_out, 1], stays f32
        x2 = x.reshape(B * c_in, TN)                # free row-major reshape
        if use_bf16_inputs:
            x2 = x2.astype(jnp.bfloat16)
            w_bd = w_bd.astype(jnp.bfloat16)

        out = pl.pallas_call(
            _align_conv_kernel,
            out_shape=jax.ShapeDtypeStruct((B * c_out, TN), jnp.float32),
            grid=(num_blocks,),
            in_specs=[
                pl.BlockSpec((Bb * c_in, TN), lambda g: (g, 0)),
                pl.BlockSpec((Bb * c_out, Bb * c_in), lambda g: (0, 0)),
                pl.BlockSpec((Bb * c_out, 1), lambda g: (0, 0)),
            ],
            out_specs=pl.BlockSpec((Bb * c_out, TN), lambda g: (g, 0)),
            compiler_params=cparams,
        )(x2, w_bd, b_bd)
    else:                                           # zero channel-pad branch
        x3 = x.reshape(B, c_in, TN)                 # free row-major reshape
        out = pl.pallas_call(
            _align_pad_kernel,
            out_shape=jax.ShapeDtypeStruct((B, c_out, TN), x.dtype),
            grid=(num_blocks,),
            in_specs=[pl.BlockSpec((Bb, c_in, TN), lambda g: (g, 0, 0))],
            out_specs=pl.BlockSpec((Bb, c_out, TN), lambda g: (g, 0, 0)),
            compiler_params=cparams,
        )(x3)

    return out.reshape(B, c_out, T, N)


# ---------------------------------- main ------------------------------------ #

if __name__ == "__main__":
    key = jax.random.PRNGKey(0)
    k1, k2, k3 = jax.random.split(key, 3)

    B, T, N = 2, 16, 16

    # Case 1: c_in > c_out  ->  1x1 align conv (single fused Pallas matmul).
    c_in, c_out = 8, 4
    x = jax.random.normal(k1, (B, c_in, T, N), dtype=jnp.float32)
    params = make_align_params(k2, c_in, c_out)
    out = jax.block_until_ready(align_forward(x, params, c_in, c_out))
    ref = (jnp.einsum("oc,bctn->botn", params["w"], x)
           + params["b"].reshape(1, c_out, 1, 1))
    assert out.shape == (B, c_out, T, N), out.shape
    assert bool(jnp.all(jnp.isfinite(out)))
    assert bool(jnp.allclose(out, ref, atol=1e-5, rtol=1e-5))

    # Case 1b: same conv, bf16 inputs to the MXU (f32 accumulate + epilogue).
    out_bf16 = jax.block_until_ready(
        align_forward(x, params, c_in, c_out, use_bf16_inputs=True))
    assert bool(jnp.allclose(out_bf16, ref, atol=3e-2, rtol=3e-2))

    # Case 2: c_in < c_out  ->  zero channel padding (single Pallas kernel).
    c_in2, c_out2 = 4, 8
    x2 = jax.random.normal(k3, (B, c_in2, T, N), dtype=jnp.float32)
    out2 = jax.block_until_ready(align_forward(x2, {}, c_in2, c_out2))
    ref2 = jnp.concatenate(
        [x2, jnp.zeros((B, c_out2 - c_in2, T, N), x2.dtype)], axis=1)
    assert out2.shape == (B, c_out2, T, N), out2.shape
    assert bool(jnp.allclose(out2, ref2))

    # Case 3: c_in == c_out -> identity (no kernel launched, same as PyTorch).
    out3 = align_forward(x, params, c_in, c_in)
    assert out3 is x

    print("KERNEL_OK")
</pallas_src>

<mosaic_0001>
module attributes {stable_mosaic.version = 11 : i64} {
  func.func @_align_conv_kernel(%arg0: i32, %arg1: memref<16x256xf32, #tpu.memory_space<vmem>>, %arg2: memref<8x16xf32, #tpu.memory_space<vmem>>, %arg3: memref<8x1xf32, #tpu.memory_space<vmem>>, %arg4: memref<8x256xf32, #tpu.memory_space<vmem>>) attributes {dimension_semantics = [#tpu.dimension_semantics<parallel>], iteration_bounds = array<i64: 1>, scalar_prefetch = 0 : i64, scratch_operands = 0 : i64, tpu.core_type = #tpu.core_type<tc>, window_params = [{transform_indices = @transform_0, window_bounds = array<i64: 16, 256>}, {pipeline_mode = #tpu.pipeline_mode<synchronous>, transform_indices = @transform_1, window_bounds = array<i64: 8, 16>}, {pipeline_mode = #tpu.pipeline_mode<synchronous>, transform_indices = @transform_2, window_bounds = array<i64: 8, 1>}, {transform_indices = @transform_3, window_bounds = array<i64: 8, 256>}]} {
    %c0 = arith.constant 0 : index
    %c0_0 = arith.constant 0 : index
    %0 = vector.load %arg2[%c0, %c0_0] : memref<8x16xf32, #tpu.memory_space<vmem>>, vector<8x16xf32>
    %c0_1 = arith.constant 0 : index
    %c0_2 = arith.constant 0 : index
    %1 = vector.load %arg1[%c0_1, %c0_2] : memref<16x256xf32, #tpu.memory_space<vmem>>, vector<16x256xf32>
    %cst = arith.constant dense<0.000000e+00> : vector<8x256xf32>
    %2 = tpu.matmul %0, %1, %cst {dimension_numbers = #tpu.dot_dimension_numbers<[1], [0], [0], [1], [0, 0, 1, 1], [], []>} : vector<8x16xf32>, vector<16x256xf32>, vector<8x256xf32> -> vector<8x256xf32>
    %c0_3 = arith.constant 0 : index
    %c0_4 = arith.constant 0 : index
    %3 = vector.load %arg3[%c0_3, %c0_4] : memref<8x1xf32, #tpu.memory_space<vmem>>, vector<8x1xf32>
    %4 = vector.broadcast %3 : vector<8x1xf32> to vector<8x256xf32>
    %5 = arith.addf %2, %4 : vector<8x256xf32>
    %c0_5 = arith.constant 0 : index
    %c0_6 = arith.constant 0 : index
    %6 = vector.load %arg4[%c0_5, %c0_6] : memref<8x256xf32, #tpu.memory_space<vmem>>, vector<8x256xf32>
    tpu.vector_store %arg4[%c0_5, %c0_6], %5 {strides = array<i32>} : memref<8x256xf32, #tpu.memory_space<vmem>>, vector<8x256xf32>,
    return
  }
  func.func @transform_0(%arg0: i32) -> (i32, i32) {
    %c0_i32 = arith.constant 0 : i32
    %c0_i32_0 = arith.constant 0 : i32
    return %arg0, %c0_i32 : i32, i32
  }
  func.func @transform_1(%arg0: i32) -> (i32, i32) {
    %c0_i32 = arith.constant 0 : i32
    %c0_i32_0 = arith.constant 0 : i32
    %c0_i32_1 = arith.constant 0 : i32
    return %c0_i32, %c0_i32_0 : i32, i32
  }
  func.func @transform_2(%arg0: i32) -> (i32, i32) {
    %c0_i32 = arith.constant 0 : i32
    %c0_i32_0 = arith.constant 0 : i32
    %c0_i32_1 = arith.constant 0 : i32
    return %c0_i32, %c0_i32_0 : i32, i32
  }
  func.func @transform_3(%arg0: i32) -> (i32, i32) {
    %c0_i32 = arith.constant 0 : i32
    %c0_i32_0 = arith.constant 0 : i32
    return %arg0, %c0_i32 : i32, i32
  }
}

</mosaic_0001>

<bundles_post_ra>
// kernel: tpu_custom_call.1
= control target key start
LH: loop header
LB: loop body
LE: loop exit
PB: predicated region body
PF: predicated region fallthrough
CT: control target
= control target key end

     0   :  { %8 = vsyncpa [#allocation3], 0  ;;  %s248_s0 = inlined_call_operand.hbm [shape: f32[16,256], index: 0, kind: input, shape index: {}]   ;;  %s249_s1 = inlined_call_operand.vmem [shape: f32[8,16], index: 1, kind: input, shape index: {}]   ;;  %s250_s2 = inlined_call_operand.vmem [shape: f32[8,1], index: 2, kind: input, shape index: {}]   ;;  %s251_s3 = inlined_call_operand.hbm [shape: f32[8,256], index: 3, kind: output, shape index: {}]  }
   0x1   :  { %9 = vsyncpa [#allocation4], 0  ;;  %s192_s12 = smov [#allocation2]   ;;  %s144_s16 = scalar_lea.hbm %s248_s0, 512 }
   0x2   :  { %s15_s13 = sshll.u32 %s192_s12, 4  ;;  %p145_p0 = scmp.ne.s32.totalorder %s248_s0, %s144_s16  ;;  %s16_s13 = int_to_ptr.vmem [resolvable:$true] %s15_s13 }
   0x3   :  { %p148_p1 = scmp.lt.u32.totalorder %s144_s16, %s248_s0 }
   0x5   :  { %p150_p2 = pnand %p148_p1, %p145_p0 }
   0x7   :  { %153 = shalt.err (!%p150_p2)
}
   0x8   :  { %s154_s21 = scalar_lea.vmem %s16_s13, 512  ;;  %p159_p4 = scmp.lt.s32.totalorder %s16_s13, %s16_s13 }
   0x9   :  { %p155_p3 = scmp.ne.s32.totalorder %s16_s13, %s154_s21  ;;  %p160_p5 = scmp.lt.s32.totalorder %s154_s21, %s154_s21 }
   0xb   :  { %p161_p6 = por %p160_p5, %p159_p4 }
   0xd   :  { %p162_p7 = pnand %p161_p6, %p155_p3 }
   0xf   :  { %165 = shalt.err (!%p162_p7)
}
  0x10   :  { %s193_s22 = smov 256   ;;  %s194_s23 = smov 16  }
  0x11   :  { %21 = dma.hbm_to_vmem [thread:$0]  %s248_s0, 512, %s16_s13, [#allocation3], %s193_s22, %s193_s22, %s194_s23  }
  0x12   :  { %188 = dma.done.wait [#allocation3], 512  }
  0x13   :  { %189 = vsyncadd [#allocation3], 4294966784  ;;  %v195_v0 = vmov 0.0   ;;  %v196_v1 = vmov 0   ;;  %v31_v2 = vld [vmem:[#allocation2 + $0x8] sm:$0xff]  ;;  %v33_v3 = vld [vmem:[#allocation2 + $0x18] sm:$0xff] }
  0x14   :  { %108 = vmatprep.mubr.f32.mxu0 %v195_v0  ;;  %143 = vset.pattern.permute.xlu0 %v196_v1  ;;  %v30_v4 = vld [vmem:[#allocation2] sm:$0xff]  ;;  %v133_v5 = vpack.c.bf16 %v33_v3, %v31_v2  ;;  %v32_v6 = vld [vmem:[#allocation2 + $0x10] sm:$0xff]  ;;  %vm40_vm0 = vcmask 130048   ;;  %s197_s29 = smov [#allocation5]  }
  0x15   :  { %v34_v7 = vld [vmem:[%s250_s2] sm:$0xff]  ;;  %v135_v8 = vpack.c.bf16 %v32_v6, %v30_v4  ;;  %s123_s30 = sshll.u32 %s197_s29, 4  ;;  %s124_s30 = int_to_ptr.vmem [resolvable:$true] %s123_s30 }
  0x16   :  { %37 = vperm.xlu0 %143, %v34_v7   ;;  %134 = vmatprep.subr.bf16.mxu0 %v133_v5  ;;  %v29_v9 = vld [vmem:[%s249_s1] sm:$0xff]  ;;  %s166_s2 = scalar_lea.vmem %s124_s30, 256  ;;  %p171_p9 = scmp.lt.s32.totalorder %s124_s30, %s124_s30 }
  0x17   :  { %136 = vmatpush1.bf16.msra.mxu0 %v135_v8  ;;  %p167_p8 = scmp.ne.s32.totalorder %s124_s30, %s166_s2  ;;  %p172_p10 = scmp.lt.s32.totalorder %s166_s2, %s166_s2 }
  0x19   :  { %p173_p11 = por %p172_p10, %p171_p9 }
  0x1a   :  { %132 = vmatmul.mubr.msk.f32.vlgmr.msra.gmra.mrb[0].mxu0 %vm40_vm0, %v29_v9 }
  0x1b   :  { %p174_p12 = pnand %p173_p11, %p167_p8 }
  0x95   :  { %v38_v10 = vpop.permute.xlu0 %37 }
  0xed   :  { %v110_v11 = vpop.f32.mrb[0].mxu0 }
  0xee   :  { %v111_v12 = vadd.f32 %v110_v11, %v38_v10  ;;  %v112_v13 = vpop.f32.mrb[1].mxu0 }
  0xef   :  { %v113_v14 = vadd.f32 %v112_v13, %v38_v10 }
  0xf0   :  { %115 = vst [vmem:[#allocation5] sm:$0xff] %v111_v12 }
  0xf1   :  { %116 = vst [vmem:[#allocation5 + $0x8] sm:$0xff] %v113_v14 }
  0xf2   :  { %177 = shalt.err (!%p174_p12)
}
  0xf3   :  { %s178_s5 = scalar_lea.hbm %s251_s3, 256 }
  0xf4   :  { %p179_p13 = scmp.ne.s32.totalorder %s251_s3, %s178_s5  ;;  %p182_p0 = scmp.lt.u32.totalorder %s178_s5, %s251_s3 }
  0xf6   :  { %p184_p1 = pnand %p182_p0, %p179_p13 }
  0xf8   :  { %187 = shalt.err (!%p184_p1)
}
  0xf9   :  { %126 = dma.vmem_to_hbm [thread:$0]  %s124_s30, 256, %s251_s3, [#allocation4]  }
  0xfa   :  { %190 = dma.done.wait [#allocation4], 256  }
  0xfb   :  { %191 = vsyncadd [#allocation4], 4294967040 }
  0xfc   :  { %130 = vsyncpa [#allocation3], 1 }
  0xfd   :  { %131 = vsyncpa [#allocation4], 1 }

</bundles_post_ra>
